<compile_context>
chip_gen: v7x
topology: tpu7x:2x2x1
jax: 0.10.0
libtpu: 0.0.40
codegen_flags: <defaults>
</compile_context>

<pallas_src>
import functools

import jax
import jax.numpy as jnp
from jax.experimental import pallas as pl
from jax.experimental.pallas import tpu as pltpu

NEG_SLOPE = 0.01           # nn.LeakyReLU default
_ROWS_TARGET = 1024        # target MLP rows (matmul M dim) per grid step
_POINT_TILE_CAP = 512      # max point tile for the point-tiled kernel
_VPU_LAYER1_MAX_K = 8      # do layer 1 on the VPU when D_in <= this


def _leaky_relu(x):
    return jnp.where(x > 0, x, NEG_SLOPE * x)


def _mlp(x, w1, b1, w2, b2, w3, b3, *, vpu_layer1):
    """3-layer MLP on an (M, D_in) tile.

    Weights are bf16 values, biases f32; returns f32 (M, E).  Matmuls
    accumulate in f32 on the MXU.  Layer 1 (K = D_in, tiny) is done as D_in
    broadcast multiply-adds on the VPU when `vpu_layer1` -- a full MXU pass
    for K=4 would be >95% padding.
    """
    if vpu_layer1:
        xf = x.astype(jnp.float32)
        w1f = w1.astype(jnp.float32)
        h = b1                                     # (1, H1) f32, broadcasts up
        for k in range(xf.shape[-1]):              # static unroll over D_in
            h = h + xf[:, k:k + 1] * w1f[k:k + 1, :]
    else:
        h = jnp.dot(x, w1, preferred_element_type=jnp.float32) + b1
    h = _leaky_relu(h)
    h = jnp.dot(h.astype(w2.dtype), w2, preferred_element_type=jnp.float32) + b2
    h = _leaky_relu(h)
    y = jnp.dot(h.astype(w3.dtype), w3, preferred_element_type=jnp.float32) + b3
    return y


# ------------------------------------------------------------- kernel A -----
def _batch_blocked_kernel(x_ref, w1_ref, b1_ref, w2_ref, b2_ref, w3_ref, b3_ref,
                          out_ref, *, n_points, vpu_layer1):
    bt, n, d_in = x_ref.shape
    x = x_ref[...].reshape(bt * n, d_in)                        # (Bt*N, D_in)
    y = _mlp(x, w1_ref[...], b1_ref[...], w2_ref[...], b2_ref[...],
             w3_ref[...], b3_ref[...], vpu_layer1=vpu_layer1)   # (Bt*N, E) f32
    e = y.shape[-1]
    mean = y.reshape(bt, n, e).sum(axis=1) * (1.0 / n_points)   # (Bt, E)
    out_ref[...] = mean.astype(out_ref.dtype)


# ------------------------------------------------------------- kernel B -----
def _point_tiled_kernel(x_ref, w1_ref, b1_ref, w2_ref, b2_ref, w3_ref, b3_ref,
                        out_ref, acc_ref, *, n_points, vpu_layer1):
    j = pl.program_id(1)

    @pl.when(j == 0)
    def _():
        acc_ref[...] = jnp.zeros_like(acc_ref)

    x = x_ref[0]                                                # (tile_n, D_in)
    y = _mlp(x, w1_ref[...], b1_ref[...], w2_ref[...], b2_ref[...],
             w3_ref[...], b3_ref[...], vpu_layer1=vpu_layer1)   # (tile_n, E) f32

    acc_rows = acc_ref.shape[0]
    if acc_rows > 1:
        # vreg-shaped partial sums: pure VPU adds per step, no XLU reduce.
        acc_ref[...] += y.reshape(-1, acc_rows, y.shape[-1]).sum(axis=0)
    else:
        acc_ref[...] += jnp.sum(y, axis=0, keepdims=True)

    @pl.when(j == pl.num_programs(1) - 1)
    def _():
        total = jnp.sum(acc_ref[...], axis=0, keepdims=True)    # one XLU reduce
        out_ref[...] = (total * (1.0 / n_points)).astype(out_ref.dtype)


# -------------------------------------------------------------- wrapper -----
def _choose_batch_tile(B, N):
    if B * N <= 2 * _ROWS_TARGET:
        return B
    cap = max(8, _ROWS_TARGET // max(N, 1))
    best = None
    for t in range(8, min(B, cap) + 1, 8):   # multiple-of-8 divisors of B
        if B % t == 0:
            best = t
    return best if best is not None else B


def _choose_point_tile(N):
    cap = min(N, _POINT_TILE_CAP)
    for t in range(cap - cap % 8, 0, -8):    # multiples of 8, descending
        if N % t == 0:
            return t
    return N                                  # full-N block is always legal


def point_embedder(x, params, *, compute_dtype=jnp.bfloat16):
    """x: (B, N, D_in) -> (B, E): mean over points of the 3-layer MLP output."""
    B, N, D_in = x.shape
    w1, b1, w2, b2, w3, b3 = params
    H1, H2, E = w1.shape[1], w2.shape[1], w3.shape[1]

    # bf16 point stream + weights; biases and accumulation stay f32.
    xq = x.astype(compute_dtype)
    w1q, w2q, w3q = (w.astype(compute_dtype) for w in (w1, w2, w3))
    b1f, b2f, b3f = (b.astype(jnp.float32) for b in (b1, b2, b3))

    vpu_layer1 = D_in <= _VPU_LAYER1_MAX_K
    out_shape = jax.ShapeDtypeStruct((B, E), x.dtype)
    w_specs = [
        pl.BlockSpec((D_in, H1), lambda *_: (0, 0)),
        pl.BlockSpec((1, H1), lambda *_: (0, 0)),
        pl.BlockSpec((H1, H2), lambda *_: (0, 0)),
        pl.BlockSpec((1, H2), lambda *_: (0, 0)),
        pl.BlockSpec((H2, E), lambda *_: (0, 0)),
        pl.BlockSpec((1, E), lambda *_: (0, 0)),
    ]

    if N <= 256 and N % 8 == 0:
        # Small N: block over batch so the flattened MXU M-dim is Bt*N.
        Bt = _choose_batch_tile(B, N)
        assert B % Bt == 0
        kernel = functools.partial(_batch_blocked_kernel, n_points=N,
                                   vpu_layer1=vpu_layer1)
        return pl.pallas_call(
            kernel,
            out_shape=out_shape,
            grid_spec=pltpu.PrefetchScalarGridSpec(
                num_scalar_prefetch=0,
                grid=(B // Bt,),
                in_specs=[pl.BlockSpec((Bt, N, D_in), lambda i: (i, 0, 0))]
                         + w_specs,
                out_specs=pl.BlockSpec((Bt, E), lambda i: (i, 0)),
            ),
            compiler_params=pltpu.CompilerParams(
                dimension_semantics=("parallel",)),
        )(xq, w1q, b1f, w2q, b2f, w3q, b3f)

    # Large N: tile over points with an f32 accumulator scratch.
    tile_n = _choose_point_tile(N)
    acc_rows = 8 if tile_n % 8 == 0 else 1
    kernel = functools.partial(_point_tiled_kernel, n_points=N,
                               vpu_layer1=vpu_layer1)
    # TODO(synk): if xprof shows exposed DMA latency, add
    # pipeline_mode=pl.Buffered(3) to the x BlockSpec below.
    # TODO(synk): on v7x with tiny B and huge N, split the point reduction
    # across the two TensorCores (per-core partial sums combined outside).
    return pl.pallas_call(
        kernel,
        out_shape=out_shape,
        grid_spec=pltpu.PrefetchScalarGridSpec(
            num_scalar_prefetch=0,
            grid=(B, N // tile_n),
            in_specs=[pl.BlockSpec((1, tile_n, D_in), lambda b, j: (b, j, 0))]
                     + w_specs,
            out_specs=pl.BlockSpec((1, E), lambda b, j: (b, 0)),
            scratch_shapes=[pltpu.VMEM((acc_rows, E), jnp.float32)],
        ),
        compiler_params=pltpu.CompilerParams(
            dimension_semantics=("parallel", "arbitrary")),
    )(xq, w1q, b1f, w2q, b2f, w3q, b3f)


# ------------------------------------------------------------ reference -----
def init_params(key, num_input_dims, hidden_sizes, embedding_size):
    """Deterministic synthetic params. Weights stored (in, out): y = x @ W + b."""
    sizes = [num_input_dims] + list(hidden_sizes) + [embedding_size]
    params = []
    for i in range(len(sizes) - 1):
        key, kw, kb = jax.random.split(key, 3)
        bound = 1.0 / (sizes[i] ** 0.5)
        w = jax.random.uniform(kw, (sizes[i], sizes[i + 1]),
                               minval=-bound, maxval=bound, dtype=jnp.float32)
        b = jax.random.uniform(kb, (1, sizes[i + 1]),
                               minval=-bound, maxval=bound, dtype=jnp.float32)
        params += [w, b]
    return tuple(params)


def point_embedder_ref(x, params, compute_dtype=jnp.float32):
    """Pure-JAX reference; compute_dtype mimics the kernel's bf16 casts."""
    w1, b1, w2, b2, w3, b3 = params
    c = lambda a: a.astype(compute_dtype)
    h = jnp.dot(c(x), c(w1), preferred_element_type=jnp.float32) + b1
    h = _leaky_relu(h)
    h = jnp.dot(c(h), c(w2), preferred_element_type=jnp.float32) + b2
    h = _leaky_relu(h)
    y = jnp.dot(c(h), c(w3), preferred_element_type=jnp.float32) + b3
    return jnp.mean(y, axis=1)


if __name__ == "__main__":
    # Small shapes: batch=2, N=16 points, 4 input dims, hidden=(32, 32), embed=32.
    B, N, D_in = 2, 16, 4
    hidden_sizes = (32, 32)
    E = 32

    key = jax.random.PRNGKey(0)
    key, kx = jax.random.split(key)
    x = jax.random.normal(kx, (B, N, D_in), dtype=jnp.float32)
    params = init_params(key, D_in, hidden_sizes, E)

    # Small-N path (batch-blocked kernel, no reduction grid axis).
    out = jax.block_until_ready(point_embedder(x, params))
    ref_bf16 = point_embedder_ref(x, params, compute_dtype=jnp.bfloat16)
    ref_f32 = point_embedder_ref(x, params)
    assert out.shape == (B, E)
    assert jnp.allclose(out, ref_bf16, atol=1e-3, rtol=1e-3)
    assert jnp.allclose(out, ref_f32, atol=5e-2, rtol=5e-2)

    # Large-N path (point-tiled kernel, tile_n=512, f32 accumulator).
    N_big = 1024
    key, kx2 = jax.random.split(key)
    x_big = jax.random.normal(kx2, (B, N_big, D_in), dtype=jnp.float32)
    out_big = jax.block_until_ready(point_embedder(x_big, params))
    ref_big = point_embedder_ref(x_big, params, compute_dtype=jnp.bfloat16)
    assert out_big.shape == (B, E)
    assert jnp.allclose(out_big, ref_big, atol=1e-3, rtol=1e-3)

    # TODO(synk): the `attention is not None` branch (attention-weighted sum over
    # points) is not implemented; it only changes the final reduction from mean
    # to a weighted sum.
    print("KERNEL_OK")
</pallas_src>

<mosaic_0001>
module attributes {stable_mosaic.version = 11 : i64} {
  func.func @_batch_blocked_kernel(%arg0: i32, %arg1: memref<2x16x4xbf16, #tpu.memory_space<vmem>>, %arg2: memref<4x32xbf16, #tpu.memory_space<vmem>>, %arg3: memref<1x32xf32, #tpu.memory_space<vmem>>, %arg4: memref<32x32xbf16, #tpu.memory_space<vmem>>, %arg5: memref<1x32xf32, #tpu.memory_space<vmem>>, %arg6: memref<32x32xbf16, #tpu.memory_space<vmem>>, %arg7: memref<1x32xf32, #tpu.memory_space<vmem>>, %arg8: memref<2x32xf32, #tpu.memory_space<vmem>>) attributes {dimension_semantics = [#tpu.dimension_semantics<parallel>], iteration_bounds = array<i64: 1>, scalar_prefetch = 0 : i64, scratch_operands = 0 : i64, tpu.core_type = #tpu.core_type<tc>, window_params = [{transform_indices = @transform_0, window_bounds = array<i64: 2, 16, 4>}, {pipeline_mode = #tpu.pipeline_mode<synchronous>, transform_indices = @transform_1, window_bounds = array<i64: 4, 32>}, {pipeline_mode = #tpu.pipeline_mode<synchronous>, transform_indices = @transform_2, window_bounds = array<i64: 1, 32>}, {pipeline_mode = #tpu.pipeline_mode<synchronous>, transform_indices = @transform_3, window_bounds = array<i64: 32, 32>}, {pipeline_mode = #tpu.pipeline_mode<synchronous>, transform_indices = @transform_4, window_bounds = array<i64: 1, 32>}, {pipeline_mode = #tpu.pipeline_mode<synchronous>, transform_indices = @transform_5, window_bounds = array<i64: 32, 32>}, {pipeline_mode = #tpu.pipeline_mode<synchronous>, transform_indices = @transform_6, window_bounds = array<i64: 1, 32>}, {transform_indices = @transform_7, window_bounds = array<i64: 2, 32>}]} {
    %c0 = arith.constant 0 : index
    %c0_0 = arith.constant 0 : index
    %c0_1 = arith.constant 0 : index
    %0 = vector.load %arg1[%c0, %c0_0, %c0_1] : memref<2x16x4xbf16, #tpu.memory_space<vmem>>, vector<2x16x4xbf16>
    %1 = vector.shape_cast %0 : vector<2x16x4xbf16> to vector<32x4xbf16>
    %c0_2 = arith.constant 0 : index
    %c0_3 = arith.constant 0 : index
    %2 = vector.load %arg2[%c0_2, %c0_3] : memref<4x32xbf16, #tpu.memory_space<vmem>>, vector<4x32xbf16>
    %c0_4 = arith.constant 0 : index
    %c0_5 = arith.constant 0 : index
    %3 = vector.load %arg3[%c0_4, %c0_5] : memref<1x32xf32, #tpu.memory_space<vmem>>, vector<1x32xf32>
    %c0_6 = arith.constant 0 : index
    %c0_7 = arith.constant 0 : index
    %4 = vector.load %arg4[%c0_6, %c0_7] : memref<32x32xbf16, #tpu.memory_space<vmem>>, vector<32x32xbf16>
    %c0_8 = arith.constant 0 : index
    %c0_9 = arith.constant 0 : index
    %5 = vector.load %arg5[%c0_8, %c0_9] : memref<1x32xf32, #tpu.memory_space<vmem>>, vector<1x32xf32>
    %c0_10 = arith.constant 0 : index
    %c0_11 = arith.constant 0 : index
    %6 = vector.load %arg6[%c0_10, %c0_11] : memref<32x32xbf16, #tpu.memory_space<vmem>>, vector<32x32xbf16>
    %c0_12 = arith.constant 0 : index
    %c0_13 = arith.constant 0 : index
    %7 = vector.load %arg7[%c0_12, %c0_13] : memref<1x32xf32, #tpu.memory_space<vmem>>, vector<1x32xf32>
    %8 = arith.extf %1 : vector<32x4xbf16> to vector<32x4xf32>
    %9 = arith.extf %2 : vector<4x32xbf16> to vector<4x32xf32>
    %10 = vector.extract_strided_slice %8 {offsets = [0, 0], sizes = [32, 1], strides = [1, 1]} : vector<32x4xf32> to vector<32x1xf32>
    %11 = vector.extract_strided_slice %9 {offsets = [0, 0], sizes = [1, 32], strides = [1, 1]} : vector<4x32xf32> to vector<1x32xf32>
    %12 = vector.broadcast %10 : vector<32x1xf32> to vector<32x32xf32>
    %13 = vector.broadcast %11 : vector<1x32xf32> to vector<32x32xf32>
    %14 = arith.mulf %12, %13 : vector<32x32xf32>
    %15 = vector.broadcast %3 : vector<1x32xf32> to vector<32x32xf32>
    %16 = arith.addf %15, %14 : vector<32x32xf32>
    %17 = vector.extract_strided_slice %8 {offsets = [0, 1], sizes = [32, 1], strides = [1, 1]} : vector<32x4xf32> to vector<32x1xf32>
    %18 = vector.extract_strided_slice %9 {offsets = [1, 0], sizes = [1, 32], strides = [1, 1]} : vector<4x32xf32> to vector<1x32xf32>
    %19 = vector.broadcast %17 : vector<32x1xf32> to vector<32x32xf32>
    %20 = vector.broadcast %18 : vector<1x32xf32> to vector<32x32xf32>
    %21 = arith.mulf %19, %20 : vector<32x32xf32>
    %22 = arith.addf %16, %21 : vector<32x32xf32>
    %23 = vector.extract_strided_slice %8 {offsets = [0, 2], sizes = [32, 1], strides = [1, 1]} : vector<32x4xf32> to vector<32x1xf32>
    %24 = vector.extract_strided_slice %9 {offsets = [2, 0], sizes = [1, 32], strides = [1, 1]} : vector<4x32xf32> to vector<1x32xf32>
    %25 = vector.broadcast %23 : vector<32x1xf32> to vector<32x32xf32>
    %26 = vector.broadcast %24 : vector<1x32xf32> to vector<32x32xf32>
    %27 = arith.mulf %25, %26 : vector<32x32xf32>
    %28 = arith.addf %22, %27 : vector<32x32xf32>
    %29 = vector.extract_strided_slice %8 {offsets = [0, 3], sizes = [32, 1], strides = [1, 1]} : vector<32x4xf32> to vector<32x1xf32>
    %30 = vector.extract_strided_slice %9 {offsets = [3, 0], sizes = [1, 32], strides = [1, 1]} : vector<4x32xf32> to vector<1x32xf32>
    %31 = vector.broadcast %29 : vector<32x1xf32> to vector<32x32xf32>
    %32 = vector.broadcast %30 : vector<1x32xf32> to vector<32x32xf32>
    %33 = arith.mulf %31, %32 : vector<32x32xf32>
    %34 = arith.addf %28, %33 : vector<32x32xf32>
    %cst = arith.constant 0.000000e+00 : f32
    %35 = vector.broadcast %cst : f32 to vector<32x32xf32>
    %36 = arith.cmpf ogt, %34, %35 : vector<32x32xf32>
    %cst_14 = arith.constant 0.00999999977 : f32
    %37 = vector.broadcast %cst_14 : f32 to vector<32x32xf32>
    %38 = arith.mulf %37, %34 : vector<32x32xf32>
    %39 = arith.select %36, %34, %38 : vector<32x32xi1>, vector<32x32xf32>
    %40 = arith.truncf %39 : vector<32x32xf32> to vector<32x32xbf16>
    %cst_15 = arith.constant dense<0.000000e+00> : vector<32x32xf32>
    %41 = tpu.matmul %40, %4, %cst_15 {dimension_numbers = #tpu.dot_dimension_numbers<[1], [0], [0], [1], [0, 0, 1, 1], [], []>} : vector<32x32xbf16>, vector<32x32xbf16>, vector<32x32xf32> -> vector<32x32xf32>
    %42 = vector.broadcast %5 : vector<1x32xf32> to vector<32x32xf32>
    %43 = arith.addf %41, %42 : vector<32x32xf32>
    %cst_16 = arith.constant 0.000000e+00 : f32
    %44 = vector.broadcast %cst_16 : f32 to vector<32x32xf32>
    %45 = arith.cmpf ogt, %43, %44 : vector<32x32xf32>
    %cst_17 = arith.constant 0.00999999977 : f32
    %46 = vector.broadcast %cst_17 : f32 to vector<32x32xf32>
    %47 = arith.mulf %46, %43 : vector<32x32xf32>
    %48 = arith.select %45, %43, %47 : vector<32x32xi1>, vector<32x32xf32>
    %49 = arith.truncf %48 : vector<32x32xf32> to vector<32x32xbf16>
    %cst_18 = arith.constant dense<0.000000e+00> : vector<32x32xf32>
    %50 = tpu.matmul %49, %6, %cst_18 {dimension_numbers = #tpu.dot_dimension_numbers<[1], [0], [0], [1], [0, 0, 1, 1], [], []>} : vector<32x32xbf16>, vector<32x32xbf16>, vector<32x32xf32> -> vector<32x32xf32>
    %51 = vector.broadcast %7 : vector<1x32xf32> to vector<32x32xf32>
    %52 = arith.addf %50, %51 : vector<32x32xf32>
    %53 = vector.shape_cast %52 : vector<32x32xf32> to vector<2x16x32xf32>
    %cst_19 = arith.constant dense<0.000000e+00> : vector<2x32xf32>
    %54 = vector.multi_reduction <add>, %53, %cst_19 [1] : vector<2x16x32xf32> to vector<2x32xf32>
    %cst_20 = arith.constant 6.250000e-02 : f32
    %55 = vector.broadcast %cst_20 : f32 to vector<2x32xf32>
    %56 = arith.mulf %54, %55 : vector<2x32xf32>
    %c0_21 = arith.constant 0 : index
    %c0_22 = arith.constant 0 : index
    %57 = vector.load %arg8[%c0_21, %c0_22] : memref<2x32xf32, #tpu.memory_space<vmem>>, vector<2x32xf32>
    tpu.vector_store %arg8[%c0_21, %c0_22], %56 {strides = array<i32>} : memref<2x32xf32, #tpu.memory_space<vmem>>, vector<2x32xf32>,
    return
  }
  func.func @transform_0(%arg0: i32) -> (i32, i32, i32) {
    %c0_i32 = arith.constant 0 : i32
    %c0_i32_0 = arith.constant 0 : i32
    %c0_i32_1 = arith.constant 0 : i32
    return %arg0, %c0_i32, %c0_i32_0 : i32, i32, i32
  }
  func.func @transform_1(%arg0: i32) -> (i32, i32) {
    %c0_i32 = arith.constant 0 : i32
    %c0_i32_0 = arith.constant 0 : i32
    %c0_i32_1 = arith.constant 0 : i32
    return %c0_i32, %c0_i32_0 : i32, i32
  }
  func.func @transform_2(%arg0: i32) -> (i32, i32) {
    %c0_i32 = arith.constant 0 : i32
    %c0_i32_0 = arith.constant 0 : i32
    %c0_i32_1 = arith.constant 0 : i32
    return %c0_i32, %c0_i32_0 : i32, i32
  }
  func.func @transform_3(%arg0: i32) -> (i32, i32) {
    %c0_i32 = arith.constant 0 : i32
    %c0_i32_0 = arith.constant 0 : i32
    %c0_i32_1 = arith.constant 0 : i32
    return %c0_i32, %c0_i32_0 : i32, i32
  }
  func.func @transform_4(%arg0: i32) -> (i32, i32) {
    %c0_i32 = arith.constant 0 : i32
    %c0_i32_0 = arith.constant 0 : i32
    %c0_i32_1 = arith.constant 0 : i32
    return %c0_i32, %c0_i32_0 : i32, i32
  }
  func.func @transform_5(%arg0: i32) -> (i32, i32) {
    %c0_i32 = arith.constant 0 : i32
    %c0_i32_0 = arith.constant 0 : i32
    %c0_i32_1 = arith.constant 0 : i32
    return %c0_i32, %c0_i32_0 : i32, i32
  }
  func.func @transform_6(%arg0: i32) -> (i32, i32) {
    %c0_i32 = arith.constant 0 : i32
    %c0_i32_0 = arith.constant 0 : i32
    %c0_i32_1 = arith.constant 0 : i32
    return %c0_i32, %c0_i32_0 : i32, i32
  }
  func.func @transform_7(%arg0: i32) -> (i32, i32) {
    %c0_i32 = arith.constant 0 : i32
    %c0_i32_0 = arith.constant 0 : i32
    return %arg0, %c0_i32 : i32, i32
  }
}

</mosaic_0001>

<bundles_post_ra>
// kernel: tpu_custom_call.1
= control target key start
LH: loop header
LB: loop body
LE: loop exit
PB: predicated region body
PF: predicated region fallthrough
CT: control target
= control target key end

     0   :  { %12 = vsyncpa [#allocation3], 0  ;;  %s653_s0 = inlined_call_operand.vmem [shape: bf16[2,16,4], index: 0, kind: input, shape index: {}]   ;;  %s654_s1 = inlined_call_operand.vmem [shape: bf16[4,32], index: 1, kind: input, shape index: {}]   ;;  %s655_s2 = inlined_call_operand.vmem [shape: f32[1,32], index: 2, kind: input, shape index: {}]   ;;  %s656_s3 = inlined_call_operand.vmem [shape: bf16[32,32], index: 3, kind: input, shape index: {}]   ;;  %s657_s4 = inlined_call_operand.hbm [shape: f32[1,32], index: 4, kind: input, shape index: {}]   ;;  %s658_s5 = inlined_call_operand.vmem [shape: bf16[32,32], index: 5, kind: input, shape index: {}]   ;;  %s659_s6 = inlined_call_operand.vmem [shape: f32[1,32], index: 6, kind: input, shape index: {}]   ;;  %s660_s7 = inlined_call_operand.hbm [shape: f32[2,32], index: 7, kind: output, shape index: {}]  }
   0x1   :  { %13 = vsyncpa [#allocation4], 0  ;;  %s548_s24 = smov [#allocation2]   ;;  %s500_s28 = scalar_lea.hbm %s657_s4, 16 }
   0x2   :  { %s28_s25 = sshll.u32 %s548_s24, 4  ;;  %p501_p0 = scmp.ne.s32.totalorder %s657_s4, %s500_s28  ;;  %s29_s25 = int_to_ptr.vmem [resolvable:$true] %s28_s25 }
   0x3   :  { %p504_p1 = scmp.lt.u32.totalorder %s500_s28, %s657_s4 }
   0x5   :  { %p506_p2 = pnand %p504_p1, %p501_p0 }
   0x7   :  { %509 = shalt.err (!%p506_p2)
}
   0x8   :  { %s510_s10 = scalar_lea.vmem %s29_s25, 16  ;;  %s514_s11 = scalar_lea.vmem %s29_s25, 32 }
   0x9   :  { %p511_p3 = scmp.ne.s32.totalorder %s29_s25, %s510_s10  ;;  %p515_p4 = scmp.lt.s32.totalorder %s29_s25, %s29_s25 }
   0xa   :  { %p516_p5 = scmp.lt.s32.totalorder %s514_s11, %s510_s10 }
   0xc   :  { %p517_p6 = por %p516_p5, %p515_p4 }
   0xe   :  { %p518_p7 = pnand %p517_p6, %p511_p3 }
  0x10   :  { %521 = shalt.err (!%p518_p7)
}
  0x11   :  { %31 = dma.hbm_to_vmem [thread:$0]  %s657_s4, 16, %s29_s25, [#allocation3]  }
  0x12   :  { %544 = dma.done.wait [#allocation3], 16  }
  0x13   :  { %545 = vsyncadd [#allocation3], 4294967280  ;;  %v549_v0 = vmov 1   ;;  %v550_v1 = vmov 0   ;;  %v412_v2 = vld [vmem:[%s653_s0] sm:$0xff]   ;;  %v419_v3 = vld [vmem:[%s653_s0 + $0x8] sm:$0xff]   ;;  %v81_v14 = vlaneseq }
  0x14   :  { %461 = vset.pattern.permute.xlu1 %v549_v0  ;;  %450 = vset.pattern.permute.xlu0 %v550_v1  ;;  %v413_v4 = vunpack.c.l.bf16 %v412_v2  ;;  %v414_v5 = vunpack.c.h.bf16 %v412_v2  ;;  %v417_v6 = vunpack.c.l.bf16 %v419_v3  ;;  %v418_v7 = vunpack.c.h.bf16 %v419_v3  ;;  %v496_v12 = vld [vmem:[%s656_s3] sm:$0xff]   ;;  %v497_v13 = vld [vmem:[%s656_s3 + $0x8] sm:$0xff]  }
  0x15   :  { %v551_v10 = vmov 2   ;;  %v552_v11 = vmov 3   ;;  %428 = vmatprep.subr.bf16.mxu0 %v496_v12  ;;  %v82_v15 = vshrl.u32 %v81_v14, 7  ;;  %v44_v16 = vld [vmem:[%s654_s1] sm:$0x3]  ;;  %vm215_vm4 = vcmask 261120  }
  0x16   :  { %v462_v8 = vpack.i.bf16 %v414_v5, %v413_v4  ;;  %v467_v9 = vpack.i.bf16 %v418_v7, %v417_v6  ;;  %429 = vmatpush3.bf16.msra.mxu0 %v496_v12  ;;  %v60_v17 = vunpack.c.l.bf16 %v44_v16  ;;  %v400_v33 = vld [vmem:[%s655_s2] ss:$0 sm:$0xff]  ;;  %vm380_vm9 = vcmask 1041409  }
  0x17   :  { %430 = vmatprep.subr.bf16.mxu0 %v497_v13  ;;  %v83_v18 = vsub.s32 0, %v82_v15  ;;  %v117_v26 = vsub.s32 1, %v82_v15  ;;  %v145_v27 = vsub.s32 2, %v82_v15  ;;  %v173_v32 = vsub.s32 3, %v82_v15 }
  0x18   :  { %463 = vperm.xlu1 %461, %v462_v8   ;;  %452 = vperm.xlu0 %450, %v462_v8   ;;  %vm383_vm10 = vcmask 254976  }
  0x19   :  { %v84_v21 = vrot.slane %v60_v17, %v83_v18  ;;  %v118_v38 = vrot.slane %v60_v17, %v117_v26  ;;  %v146_v41 = vrot.slane %v60_v17, %v145_v27  ;;  %v174_v54 = vrot.slane %v60_v17, %v173_v32 }
  0x1a   :  { %431 = vmatpush3.bf16.msra.mxu0 %v497_v13 }
  0x1c   :  { %468 = vperm.xlu1 %461, %v467_v9   ;;  %457 = vperm.xlu0 %450, %v467_v9  }
  0x20   :  { %478 = vset.pattern.permute.xlu1 %v551_v10  ;;  %472 = vset.pattern.permute.xlu0 %v551_v10 }
  0x21   :  { %480 = vperm.xlu1 %478, %v467_v9   ;;  %474 = vperm.xlu0 %472, %v462_v8  }
  0x25   :  { %484 = vset.pattern.permute.xlu1 %v552_v11  ;;  %490 = vset.pattern.permute.xlu0 %v552_v11 }
  0x26   :  { %486 = vperm.xlu1 %484, %v462_v8   ;;  %492 = vperm.xlu0 %490, %v467_v9  }
  0x97   :  { %v464_v19 = vpop.permute.xlu1 %463  ;;  %v453_v20 = vpop.permute.xlu0 %452 }
  0x98   :  { %v455_v22 = vunpack.i.h.bf16 %v453_v20  ;;  %v454_v23 = vunpack.i.l.bf16 %v453_v20  ;;  %v466_v39 = vunpack.i.h.bf16 %v464_v19  ;;  %v465_v40 = vunpack.i.l.bf16 %v464_v19 }
  0x9a   :  { %v86_v30 = vmul.f32 %v455_v22, %v84_v21  ;;  %v85_v31 = vmul.f32 %v454_v23, %v84_v21  ;;  %v120_v55 = vmul.f32 %v466_v39, %v118_v38  ;;  %v119_v56 = vmul.f32 %v465_v40, %v118_v38 }
  0x9b   :  { %v469_v24 = vpop.permute.xlu1 %468  ;;  %v458_v25 = vpop.permute.xlu0 %457 }
  0x9c   :  { %v460_v28 = vunpack.i.h.bf16 %v458_v25  ;;  %v459_v29 = vunpack.i.l.bf16 %v458_v25  ;;  %v471_v34 = vunpack.i.h.bf16 %v469_v24  ;;  %v470_v35 = vunpack.i.l.bf16 %v469_v24 }
  0x9d   :  { %v96_v48 = vadd.f32 %v400_v33, %v86_v30  ;;  %v95_v49 = vadd.f32 %v400_v33, %v85_v31  ;;  %v499_v30 = vld [vmem:[%s658_s5 + $0x8] sm:$0xff]   ;;  %v401_v31 = vld [vmem:[#allocation2] ss:$0 sm:$0xff] }
  0x9e   :  { %v88_v36 = vmul.f32 %v460_v28, %v84_v21  ;;  %v87_v37 = vmul.f32 %v459_v29, %v84_v21  ;;  %v122_v52 = vmul.f32 %v471_v34, %v118_v38  ;;  %v121_v53 = vmul.f32 %v470_v35, %v118_v38  ;;  %v498_v29 = vld [vmem:[%s658_s5] sm:$0xff]  }
  0x9f   :  { %v123_v1 = vadd.f32 %v119_v56, %v95_v49  ;;  %v124_v2 = vadd.f32 %v120_v55, %v96_v48  ;;  %436 = vmatprep.subr.bf16.mxu1 %v498_v29 }
  0xa0   :  { %v481_v42 = vpop.permute.xlu1 %480  ;;  %v475_v43 = vpop.permute.xlu0 %474  ;;  %v98_v44 = vadd.f32 %v400_v33, %v88_v36  ;;  %v97_v45 = vadd.f32 %v400_v33, %v87_v37  ;;  %437 = vmatpush3.bf16.msra.mxu1 %v498_v29 }
  0xa1   :  { %v483_v46 = vunpack.i.h.bf16 %v481_v42  ;;  %v482_v47 = vunpack.i.l.bf16 %v481_v42  ;;  %v477_v50 = vunpack.i.h.bf16 %v475_v43  ;;  %v476_v51 = vunpack.i.l.bf16 %v475_v43  ;;  %438 = vmatprep.subr.bf16.mxu1 %v499_v30 }
  0xa2   :  { %v125_v60 = vadd.f32 %v121_v53, %v97_v45  ;;  %v126_v61 = vadd.f32 %v122_v52, %v98_v44 }
  0xa3   :  { %v148_v57 = vmul.f32 %v477_v50, %v146_v41  ;;  %v147_v58 = vmul.f32 %v476_v51, %v146_v41  ;;  %v150_v59 = vmul.f32 %v483_v46, %v146_v41  ;;  %v149_v62 = vmul.f32 %v482_v47, %v146_v41  ;;  %v406_v50 = vld [vmem:[%s659_s6] ss:$0 sm:$0xff]  ;;  %s553_s6 = smov [#allocation5]  }
  0xa4   :  { %439 = vmatpush3.bf16.msra.mxu1 %v499_v30  ;;  %s391_s26 = sshll.u32 %s553_s6, 4  ;;  %s392_s26 = int_to_ptr.vmem [resolvable:$true] %s391_s26 }
  0xa5   :  { %v487_v63 = vpop.permute.xlu1 %486  ;;  %v493_v0 = vpop.permute.xlu0 %492  ;;  %v151_v7 = vadd.f32 %v147_v58, %v123_v1  ;;  %v152_v8 = vadd.f32 %v148_v57, %v124_v2  ;;  %v153_v11 = vadd.f32 %v149_v62, %v125_v60  ;;  %v154_v12 = vadd.f32 %v150_v59, %v126_v61  ;;  %s522_s27 = scalar_lea.vmem %s392_s26, 32  ;;  %p527_p9 = scmp.lt.s32.totalorder %s392_s26, %s392_s26 }
  0xa6   :  { %v489_v3 = vunpack.i.h.bf16 %v487_v63  ;;  %v488_v4 = vunpack.i.l.bf16 %v487_v63  ;;  %v495_v5 = vunpack.i.h.bf16 %v493_v0  ;;  %v494_v6 = vunpack.i.l.bf16 %v493_v0  ;;  %p523_p8 = scmp.ne.s32.totalorder %s392_s26, %s522_s27  ;;  %p528_p10 = scmp.lt.s32.totalorder %s522_s27, %s522_s27 }
  0xa8   :  { %v176_v9 = vmul.f32 %v489_v3, %v174_v54  ;;  %v175_v10 = vmul.f32 %v488_v4, %v174_v54  ;;  %v178_v13 = vmul.f32 %v495_v5, %v174_v54  ;;  %v177_v14 = vmul.f32 %v494_v6, %v174_v54  ;;  %p529_p11 = por %p528_p10, %p527_p9 }
  0xaa   :  { %v179_v15 = vadd.f32 %v175_v10, %v151_v7  ;;  %v180_v16 = vadd.f32 %v176_v9, %v152_v8  ;;  %v181_v17 = vadd.f32 %v177_v14, %v153_v11  ;;  %v182_v18 = vadd.f32 %v178_v13, %v154_v12  ;;  %p530_p12 = pnand %p529_p11, %p523_p8 }
  0xac   :  { %vm183_vm0 = vcmp.gt.f32.partialorder %v179_v15, 0.0  ;;  %vm184_vm1 = vcmp.gt.f32.partialorder %v180_v16, 0.0  ;;  %v187_v19 = vmul.f32 0.01, %v179_v15  ;;  %v188_v20 = vmul.f32 0.01, %v180_v16 }
  0xad   :  { %vm185_vm2 = vcmp.gt.f32.partialorder %v181_v17, 0.0  ;;  %vm186_vm3 = vcmp.gt.f32.partialorder %v182_v18, 0.0  ;;  %v189_v21 = vmul.f32 0.01, %v181_v17  ;;  %v190_v22 = vmul.f32 0.01, %v182_v18 }
  0xae   :  { %v191_v23 = vsel %vm183_vm0, %v179_v15, %v187_v19  ;;  %v192_v24 = vsel %vm184_vm1, %v180_v16, %v188_v20 }
  0xaf   :  { %v195_v25 = vpack.c.bf16 %v192_v24, %v191_v23  ;;  %v193_v26 = vsel %vm185_vm2, %v181_v17, %v189_v21  ;;  %v194_v27 = vsel %vm186_vm3, %v182_v18, %v190_v22 }
  0xb0   :  { %v196_v28 = vpack.c.bf16 %v194_v27, %v193_v26 }
  0xb1   :  { %432 = vmatprep.mubr.msk.bf16.mxu0 %vm215_vm4, %v195_v25 }
  0xb2   :  { %433 = vmatmul.mubr.msk.bf16.vlgmr.msra.gmra.mrb[0].mxu0 %vm215_vm4, %v196_v28 }
 0x185   :  { %v434_v32 = vpop.f32.mrb[0].mxu0 }
 0x186   :  { %v265_v33 = vadd.f32 %v434_v32, %v401_v31  ;;  %v256_v34 = vpop.f32.mrb[1].mxu0 }
 0x187   :  { %v257_v35 = vadd.f32 %v401_v31, %v256_v34  ;;  %v435_v36 = vpop.f32.mrb[2].mxu0 }
 0x188   :  { %v277_v37 = vmul.f32 0.01, %v265_v33  ;;  %v268_v38 = vadd.f32 %v435_v36, %v401_v31  ;;  %v259_v39 = vpop.f32.mrb[3].mxu0  ;;  %vm273_vm5 = vcmp.gt.f32.partialorder %v265_v33, 0.0 }
 0x189   :  { %v275_v40 = vmul.f32 0.01, %v257_v35  ;;  %v260_v41 = vadd.f32 %v401_v31, %v259_v39  ;;  %vm271_vm7 = vcmp.gt.f32.partialorder %v257_v35, 0.0 }
 0x18a   :  { %vm274_vm6 = vcmp.gt.f32.partialorder %v268_v38, 0.0  ;;  %v278_v42 = vmul.f32 0.01, %v268_v38  ;;  %v281_v44 = vsel %vm273_vm5, %v265_v33, %v277_v37 }
 0x18b   :  { %v276_v43 = vmul.f32 0.01, %v260_v41  ;;  %vm272_vm8 = vcmp.gt.f32.partialorder %v260_v41, 0.0  ;;  %v279_v47 = vsel %vm271_vm7, %v257_v35, %v275_v40 }
 0x18c   :  { %v282_v45 = vsel %vm274_vm6, %v268_v38, %v278_v42 }
 0x18d   :  { %v284_v46 = vpack.c.bf16 %v282_v45, %v281_v44  ;;  %v280_v48 = vsel %vm272_vm8, %v260_v41, %v276_v43 }
 0x18e   :  { %v283_v49 = vpack.c.bf16 %v280_v48, %v279_v47 }
 0x190   :  { %440 = vmatprep.mubr.msk.bf16.mxu1 %vm215_vm4, %v283_v49 }
 0x191   :  { %441 = vmatmul.mubr.msk.bf16.vlgmr.msra.gmra.mrb[0].mxu1 %vm215_vm4, %v284_v46 }
 0x264   :  { %v442_v51 = vpop.f32.mrb[0].mxu1 }
 0x265   :  { %v352_v52 = vadd.f32 %v442_v51, %v406_v50  ;;  %v343_v53 = vpop.f32.mrb[1].mxu1 }
 0x266   :  { %v344_v54 = vadd.f32 %v406_v50, %v343_v53  ;;  %v443_v55 = vpop.f32.mrb[2].mxu1 }
 0x267   :  { %v355_v56 = vadd.f32 %v443_v55, %v406_v50  ;;  %v346_v57 = vpop.f32.mrb[3].mxu1  ;;  %v367_v59 = vsel %vm215_vm4, %v352_v52, 0.0 }
 0x268   :  { %v347_v58 = vadd.f32 %v406_v50, %v346_v57  ;;  %v358_v61 = vsel %vm215_vm4, %v344_v54, 0.0 }
 0x269   :  { %v368_v60 = vsel %vm215_vm4, %v355_v56, 0.0 }
 0x26a   :  { %v369_v62 = vadd.f32 %v368_v60, %v367_v59  ;;  %v359_v63 = vsel %vm215_vm4, %v347_v58, 0.0 }
 0x26b   :  { %v360_v0 = vadd.f32 %v359_v63, %v358_v61 }
 0x26c   :  { %v370_v1 = vrot.slane %v369_v62, 4 }
 0x26d   :  { %v361_v2 = vrot.slane %v360_v0, 4 }
 0x26e   :  { %v371_v3 = vadd.f32 %v370_v1, %v369_v62 }
 0x26f   :  { %v362_v4 = vadd.f32 %v361_v2, %v360_v0 }
 0x270   :  { %v372_v5 = vrot.slane %v371_v3, 2 }
 0x271   :  { %v363_v6 = vrot.slane %v362_v4, 2 }
 0x272   :  { %v373_v7 = vadd.f32 %v372_v5, %v371_v3 }
 0x273   :  { %v364_v8 = vadd.f32 %v363_v6, %v362_v4 }
 0x274   :  { %v374_v9 = vrot.slane %v373_v7, 1 }
 0x275   :  { %v365_v10 = vrot.slane %v364_v8, 1 }
 0x276   :  { %v375_v11 = vadd.f32 %v374_v9, %v373_v7 }
 0x277   :  { %v366_v12 = vadd.f32 %v365_v10, %v364_v8 }
 0x278   :  { %v377_v13 = vmul.f32 0.0625, %v375_v11 }
 0x279   :  { %v376_v14 = vmul.f32 0.0625, %v366_v12 }
 0x27b   :  { %v381_v15 = vsel %vm380_vm9, %v377_v13, %v376_v14 }
 0x27c   :  { %384 = vst.msk [vmem:[#allocation5] sm:$0x3] %vm383_vm10, %v381_v15 }
 0x27d   :  { %533 = shalt.err (!%p530_p12)
}
 0x27e   :  { %s534_s30 = scalar_lea.hbm %s660_s7, 32 }
 0x27f   :  { %p535_p13 = scmp.ne.s32.totalorder %s660_s7, %s534_s30  ;;  %p538_p0 = scmp.lt.u32.totalorder %s534_s30, %s660_s7 }
 0x281   :  { %p540_p1 = pnand %p538_p0, %p535_p13 }
 0x283   :  { %543 = shalt.err (!%p540_p1)
}
 0x284   :  { %394 = dma.vmem_to_hbm [thread:$0]  %s392_s26, 32, %s660_s7, [#allocation4]  }
 0x285   :  { %546 = dma.done.wait [#allocation4], 32  }
 0x286   :  { %547 = vsyncadd [#allocation4], 4294967264 }
 0x287   :  { %398 = vsyncpa [#allocation3], 1 }
 0x288   :  { %399 = vsyncpa [#allocation4], 1 }

</bundles_post_ra>
